<compile_context>
chip_gen: v7x
topology: tpu7x:2x2x1
jax: 0.10.0
libtpu: 0.0.40
codegen_flags: <defaults>
</compile_context>

<pallas_src>
import functools

import jax
import jax.numpy as jnp
from jax.experimental import pallas as pl
from jax.experimental.pallas import tpu as pltpu

LATENT_DIM = 128


def _rup(x, m):
    return ((x + m - 1) // m) * m


def _apply_act(r, act):
    if act == "relu":
        return jnp.maximum(r, 0.0)
    if act == "tanh":
        return jnp.tanh(r)
    return r


# ----------------------------------------------------------------------------
# Pallas kernels
# ----------------------------------------------------------------------------
def _mm_kernel_single(a_ref, b_ref, bias_ref, o_ref, *, act):
    # Whole K fits in one tile: no accumulator scratch, direct epilogue.
    r = jnp.dot(a_ref[...], b_ref[...], preferred_element_type=jnp.float32)
    r = r + bias_ref[...]
    o_ref[...] = _apply_act(r, act).astype(o_ref.dtype)


def _mm_kernel_multi(a_ref, b_ref, bias_ref, o_ref, acc_ref, *, act):
    # K streamed over grid axis 2 (encoder FC only).
    @pl.when(pl.program_id(2) == 0)
    def _():
        acc_ref[...] = jnp.zeros_like(acc_ref)

    acc_ref[...] += jnp.dot(a_ref[...], b_ref[...],
                            preferred_element_type=jnp.float32)

    @pl.when(pl.program_id(2) == pl.num_programs(2) - 1)
    def _():
        r = acc_ref[...] + bias_ref[...]
        o_ref[...] = _apply_act(r, act).astype(o_ref.dtype)


def _phase_mm_kernel(a_ref, b_ref, bias_ref, o_ref, *, act):
    # Fused conv-transpose: leading grid axis selects the sub-pixel phase.
    r = jnp.dot(a_ref[...], b_ref[...], preferred_element_type=jnp.float32)
    r = r + bias_ref[...]
    o_ref[...] = _apply_act(r, act).astype(o_ref.dtype)


# ----------------------------------------------------------------------------
# GEMM wrappers
# ----------------------------------------------------------------------------
_VMEM_LIMIT = 32 << 20  # safe on v5e/v6e (128 MiB) and v7x (64 MiB)


def matmul_bias_act(a, b, bias, act="none", out_dtype=jnp.bfloat16,
                    max_tk=4096, max_tn=2048):
    """activation(a @ b + bias); bf16 MXU operands, f32 accumulate/epilogue."""
    M, K = a.shape
    Kb, N = b.shape
    assert K == Kb
    a = a.astype(jnp.bfloat16)
    b = b.astype(jnp.bfloat16)
    bias = bias.astype(jnp.float32)

    # M tiling (bf16 packs 16 sublanes); narrow-N layers get a bigger tile.
    max_tm = 512 if N >= 128 else 2048
    Mp = _rup(M, 16)
    tm = min(Mp, max_tm)
    Mp = _rup(Mp, tm)

    # N tiling: narrow outputs keep the full, unpadded lane dim (masked vst).
    if N < 128:
        Np, tn = N, N
        bias_p = bias
    else:
        Np = _rup(N, 128)
        tn = min(Np, max_tn)
        Np = _rup(Np, tn)
        bias_p = bias if Np == N else jnp.pad(bias, (0, Np - N))

    # K tiling: single step whenever K fits one tile.
    if K <= max_tk:
        Kp, tk = K, K
    else:
        Kp = _rup(K, 128)
        tk = max_tk
        Kp = _rup(Kp, tk)

    if (Mp, Kp) != (M, K):
        a = jnp.pad(a, ((0, Mp - M), (0, Kp - K)))
    if (Kp, Np) != (K, N):
        b = jnp.pad(b, ((0, Kp - K), (0, Np - N)))
    bias2 = bias_p.reshape(1, Np)

    if Kp == tk:
        grid = (Mp // tm, Np // tn)
        out = pl.pallas_call(
            functools.partial(_mm_kernel_single, act=act),
            out_shape=jax.ShapeDtypeStruct((Mp, Np), out_dtype),
            grid_spec=pltpu.PrefetchScalarGridSpec(
                num_scalar_prefetch=0,
                grid=grid,
                in_specs=[
                    pl.BlockSpec((tm, tk), lambda i, j: (i, 0)),
                    pl.BlockSpec((tk, tn), lambda i, j: (0, j)),
                    pl.BlockSpec((1, tn), lambda i, j: (0, j)),
                ],
                out_specs=pl.BlockSpec((tm, tn), lambda i, j: (i, j)),
            ),
            compiler_params=pltpu.CompilerParams(
                dimension_semantics=("parallel", "parallel"),
                vmem_limit_bytes=_VMEM_LIMIT),
        )(a, b, bias2)
    else:
        grid = (Mp // tm, Np // tn, Kp // tk)
        out = pl.pallas_call(
            functools.partial(_mm_kernel_multi, act=act),
            out_shape=jax.ShapeDtypeStruct((Mp, Np), out_dtype),
            grid_spec=pltpu.PrefetchScalarGridSpec(
                num_scalar_prefetch=0,
                grid=grid,
                in_specs=[
                    pl.BlockSpec((tm, tk), lambda i, j, k: (i, k)),
                    pl.BlockSpec((tk, tn), lambda i, j, k: (k, j)),
                    pl.BlockSpec((1, tn), lambda i, j, k: (0, j)),
                ],
                out_specs=pl.BlockSpec((tm, tn), lambda i, j, k: (i, j)),
                scratch_shapes=[pltpu.VMEM((tm, tn), jnp.float32)],
            ),
            compiler_params=pltpu.CompilerParams(
                dimension_semantics=("parallel", "parallel", "arbitrary"),
                vmem_limit_bytes=_VMEM_LIMIT),
        )(a, b, bias2)

    if (Mp, Np) != (M, N):
        out = out[:M, :N]
    return out


def phase_matmul_bias_act(a, b, bias, act="none", out_dtype=jnp.bfloat16):
    """Batched-over-phase GEMM: a (P,M,K) @ b (P,K,N) + bias, one pallas_call."""
    P, M, K = a.shape
    Pb, Kb, N = b.shape
    assert P == Pb and K == Kb
    a = a.astype(jnp.bfloat16)
    b = b.astype(jnp.bfloat16)
    bias2 = bias.astype(jnp.float32).reshape(1, N)

    max_tm = 512 if N >= 128 else 2048
    Mp = _rup(M, 16)
    tm = min(Mp, max_tm)
    Mp = _rup(Mp, tm)
    if Mp != M:
        a = jnp.pad(a, ((0, 0), (0, Mp - M), (0, 0)))

    if N < 128:
        tn = N
    else:
        assert N % 128 == 0
        tn = min(N, 2048)
        assert N % tn == 0

    grid = (P, Mp // tm, N // tn)
    out = pl.pallas_call(
        functools.partial(_phase_mm_kernel, act=act),
        out_shape=jax.ShapeDtypeStruct((P, Mp, N), out_dtype),
        grid_spec=pltpu.PrefetchScalarGridSpec(
            num_scalar_prefetch=0,
            grid=grid,
            in_specs=[
                pl.BlockSpec((None, tm, K), lambda p, i, j: (p, i, 0)),
                pl.BlockSpec((None, K, tn), lambda p, i, j: (p, 0, j)),
                pl.BlockSpec((1, tn), lambda p, i, j: (0, j)),
            ],
            out_specs=pl.BlockSpec((None, tm, tn), lambda p, i, j: (p, i, j)),
        ),
        compiler_params=pltpu.CompilerParams(
            dimension_semantics=("parallel", "parallel", "parallel"),
            vmem_limit_bytes=_VMEM_LIMIT),
    )(a, b, bias2)
    if Mp != M:
        out = out[:, :M, :]
    return out


# ----------------------------------------------------------------------------
# One-time weight packing (hoisted out of the forward path)
# ----------------------------------------------------------------------------
def _pack_conv_w(w):
    # PyTorch Conv2d weight (Cout, Cin, 4, 4) -> im2col B matrix (16*Cin, Cout),
    # row order (kh, kw, cin), bf16.
    return w.transpose(2, 3, 1, 0).reshape(-1, w.shape[0]).astype(jnp.bfloat16)


def _pack_convT_w(w):
    # PyTorch ConvTranspose2d weight (Cin, Cout, 4, 4) -> stacked per-phase
    # sub-kernels (4, 4*Cin, Cout); phase p = 2*r + s, row order (tr, ts, cin).
    wf = jnp.flip(w, axis=(2, 3))
    mats = []
    for r in range(2):
        for s in range(2):
            sub = wf[:, :, r::2, s::2]                         # (Cin, Cout, 2, 2)
            mats.append(sub.transpose(2, 3, 0, 1).reshape(-1, w.shape[1]))
    return jnp.stack(mats, axis=0).astype(jnp.bfloat16)


def pack_params(raw):
    p = {}
    for i in range(1, 5):
        p[f"e{i}w"] = _pack_conv_w(raw[f"e{i}w"])
        p[f"e{i}b"] = raw[f"e{i}b"].astype(jnp.float32)
        p[f"d{i}w"] = _pack_convT_w(raw[f"d{i}w"])
        p[f"d{i}b"] = raw[f"d{i}b"].astype(jnp.float32)
    p["efw"] = raw["efw"].T.astype(jnp.bfloat16)       # (512*8*8, latent)
    p["efb"] = raw["efb"].astype(jnp.float32)
    p["dfw"] = raw["dfw"].T.astype(jnp.bfloat16)       # (latent, 512*8*8)
    p["dfb"] = raw["dfb"].astype(jnp.float32)
    return p


# ----------------------------------------------------------------------------
# Layer wrappers (NHWC activations; im2col glue in plain JAX, GEMM in Pallas)
# ----------------------------------------------------------------------------
def conv2d_nhwc(x, bmat, bias, act, out_dtype=jnp.bfloat16):
    # nn.Conv2d(kernel_size=4, stride=2, padding=1); bmat pre-packed (16*Cin, Cout).
    N, H, W, Cin = x.shape
    Cout = bmat.shape[1]
    Ho, Wo = H // 2, W // 2
    xp = jnp.pad(x, ((0, 0), (1, 1), (1, 1), (0, 0)))
    cols = []
    for kh in range(4):
        for kw in range(4):
            cols.append(xp[:, kh:kh + 2 * Ho:2, kw:kw + 2 * Wo:2, :])
    a = jnp.stack(cols, axis=3).reshape(N * Ho * Wo, 16 * Cin)   # (kh,kw,cin)
    o = matmul_bias_act(a, bmat, bias, act, out_dtype=out_dtype)
    return o.reshape(N, Ho, Wo, Cout)


def conv_transpose2d_nhwc(x, bmats, bias, act, out_dtype=jnp.bfloat16):
    # nn.ConvTranspose2d(kernel_size=4, stride=2, padding=1) via sub-pixel
    # decomposition: 4 stride-1 2x2 GEMMs fused into one pallas_call.
    # bmats pre-packed (4, 4*Cin, Cout).
    N, H, W, Cin = x.shape
    Cout = bmats.shape[2]
    xp = jnp.pad(x, ((0, 0), (1, 1), (1, 1), (0, 0)))
    phase_a = []
    for r in range(2):
        for s in range(2):
            cols = []
            for tr in range(2):
                for ts in range(2):
                    cols.append(xp[:, r + tr:r + tr + H, s + ts:s + ts + W, :])
            phase_a.append(jnp.stack(cols, axis=3).reshape(N * H * W, 4 * Cin))
    a = jnp.stack(phase_a, axis=0)                               # (4, M, 4*Cin)
    o = phase_matmul_bias_act(a, bmats, bias, act, out_dtype=out_dtype)
    o = o.reshape(2, 2, N, H, W, Cout)                           # (r, s, N, H, W, C)
    o = o.transpose(2, 3, 0, 4, 1, 5)                            # (N, H, r, W, s, C)
    return o.reshape(N, 2 * H, 2 * W, Cout)


# ----------------------------------------------------------------------------
# Parameters (deterministic synthetic init mirroring the module's shapes)
# ----------------------------------------------------------------------------
def init_raw_params(key, latent_dim=LATENT_DIM):
    def u(k, shape, fan_in):
        s = 1.0 / jnp.sqrt(jnp.float32(fan_in))
        return jax.random.uniform(k, shape, jnp.float32, -s, s)

    ks = jax.random.split(key, 20)
    p = {}
    enc = [(64, 3), (128, 64), (256, 128), (512, 256)]
    for i, (co, ci) in enumerate(enc, start=1):
        p[f"e{i}w"] = u(ks[2 * i - 2], (co, ci, 4, 4), ci * 16)
        p[f"e{i}b"] = u(ks[2 * i - 1], (co,), ci * 16)
    p["efw"] = u(ks[8], (latent_dim, 512 * 8 * 8), 512 * 8 * 8)
    p["efb"] = u(ks[9], (latent_dim,), 512 * 8 * 8)
    p["dfw"] = u(ks[10], (512 * 8 * 8, latent_dim), latent_dim)
    p["dfb"] = u(ks[11], (512 * 8 * 8,), latent_dim)
    dec = [(512, 256), (256, 128), (128, 64), (64, 3)]
    for i, (ci, co) in enumerate(dec, start=1):
        p[f"d{i}w"] = u(ks[10 + 2 * i], (ci, co, 4, 4), ci * 16)
        p[f"d{i}b"] = u(ks[11 + 2 * i], (co,), ci * 16)
    return p


# ----------------------------------------------------------------------------
# Autoencoder forward (matches the PyTorch Sequential)
# ----------------------------------------------------------------------------
def autoencoder_forward(params, x):
    p = params
    n = x.shape[0]
    h = x.transpose(0, 2, 3, 1).astype(jnp.bfloat16)          # NCHW -> NHWC once
    h = conv2d_nhwc(h, p["e1w"], p["e1b"], "relu")            # (N, 64, 64, 64)
    h = conv2d_nhwc(h, p["e2w"], p["e2b"], "relu")            # (N, 32, 32, 128)
    h = conv2d_nhwc(h, p["e3w"], p["e3b"], "relu")            # (N, 16, 16, 256)
    h = conv2d_nhwc(h, p["e4w"], p["e4b"], "relu")            # (N, 8, 8, 512)
    flat = h.transpose(0, 3, 1, 2).reshape(n, -1)             # PyTorch C-major Flatten
    latent = matmul_bias_act(flat, p["efw"], p["efb"], "none")            # (N, latent)
    d = matmul_bias_act(latent, p["dfw"], p["dfb"], "relu")               # (N, 512*8*8)
    d = d.reshape(n, 512, 8, 8).transpose(0, 2, 3, 1)         # Unflatten -> NHWC
    d = conv_transpose2d_nhwc(d, p["d1w"], p["d1b"], "relu")  # (N, 16, 16, 256)
    d = conv_transpose2d_nhwc(d, p["d2w"], p["d2b"], "relu")  # (N, 32, 32, 128)
    d = conv_transpose2d_nhwc(d, p["d3w"], p["d3b"], "relu")  # (N, 64, 64, 64)
    d = conv_transpose2d_nhwc(d, p["d4w"], p["d4b"], "tanh",
                              out_dtype=jnp.float32)          # (N, 128, 128, 3)
    return d.transpose(0, 3, 1, 2)                            # NHWC -> NCHW


# ----------------------------------------------------------------------------
# Small-shape correctness checks against XLA convs (bf16 both sides)
# ----------------------------------------------------------------------------
def _check_conv(key):
    k1, k2, k3 = jax.random.split(key, 3)
    x = jax.random.normal(k1, (2, 3, 16, 16), jnp.float32).astype(jnp.bfloat16)
    w = jax.random.normal(k2, (8, 3, 4, 4), jnp.float32) * 0.1
    b = jax.random.normal(k3, (8,), jnp.float32) * 0.1
    got = conv2d_nhwc(x.transpose(0, 2, 3, 1), _pack_conv_w(w), b, "relu",
                      out_dtype=jnp.float32).transpose(0, 3, 1, 2)
    ref = jax.lax.conv_general_dilated(
        x, w.astype(jnp.bfloat16), (2, 2), [(1, 1), (1, 1)],
        dimension_numbers=("NCHW", "OIHW", "NCHW"),
        preferred_element_type=jnp.float32)
    ref = jnp.maximum(ref + b[None, :, None, None], 0.0)
    err = float(jnp.max(jnp.abs(got - ref)))
    assert err < 1e-2, f"conv2d mismatch: {err}"


def _check_conv_transpose(key):
    k1, k2, k3 = jax.random.split(key, 3)
    x = jax.random.normal(k1, (2, 16, 8, 8), jnp.float32).astype(jnp.bfloat16)
    w = jax.random.normal(k2, (16, 4, 4, 4), jnp.float32) * 0.1   # (Cin, Cout, 4, 4)
    b = jax.random.normal(k3, (4,), jnp.float32) * 0.1
    got = conv_transpose2d_nhwc(x.transpose(0, 2, 3, 1), _pack_convT_w(w), b, "relu",
                                out_dtype=jnp.float32).transpose(0, 3, 1, 2)
    w_eq = jnp.flip(w, (2, 3)).transpose(1, 0, 2, 3).astype(jnp.bfloat16)
    ref = jax.lax.conv_general_dilated(
        x, w_eq, (1, 1), [(2, 2), (2, 2)], lhs_dilation=(2, 2),
        dimension_numbers=("NCHW", "OIHW", "NCHW"),
        preferred_element_type=jnp.float32)
    ref = jnp.maximum(ref + b[None, :, None, None], 0.0)
    err = float(jnp.max(jnp.abs(got - ref)))
    assert err < 1e-2, f"conv_transpose2d mismatch: {err}"


if __name__ == "__main__":
    key = jax.random.PRNGKey(0)
    kx, kp, kc = jax.random.split(key, 3)

    # Correctness of the im2col / sub-pixel-phase GEMM lowering on tiny shapes.
    _check_conv(kc)
    _check_conv_transpose(kc)

    # Spatial size 128x128 is forced by Linear(512*8*8); batch kept small (2).
    x = jax.random.normal(kx, (2, 3, 128, 128), jnp.float32)
    params = pack_params(init_raw_params(kp))   # one-time weight packing

    fwd = jax.jit(autoencoder_forward)
    out = jax.block_until_ready(fwd(params, x))

    assert out.shape == (2, 3, 128, 128), out.shape
    assert out.dtype == jnp.float32
    assert bool(jnp.all(jnp.isfinite(out)))
    assert bool(jnp.all(jnp.abs(out) <= 1.0 + 1e-6))  # tanh output range
    print("KERNEL_OK")
</pallas_src>

<mosaic_0001>
module attributes {stable_mosaic.version = 11 : i64} {
  func.func @_mm_kernel_single(%arg0: i32, %arg1: i32, %arg2: memref<128x48xbf16, #tpu.memory_space<vmem>>, %arg3: memref<48x8xbf16, #tpu.memory_space<vmem>>, %arg4: memref<1x8xf32, #tpu.memory_space<vmem>>, %arg5: memref<128x8xf32, #tpu.memory_space<vmem>>) attributes {dimension_semantics = [#tpu.dimension_semantics<parallel>, #tpu.dimension_semantics<parallel>], iteration_bounds = array<i64: 1, 1>, scalar_prefetch = 0 : i64, scratch_operands = 0 : i64, tpu.core_type = #tpu.core_type<tc>, window_params = [{transform_indices = @transform_0, window_bounds = array<i64: 128, 48>}, {transform_indices = @transform_1, window_bounds = array<i64: 48, 8>}, {transform_indices = @transform_2, window_bounds = array<i64: 1, 8>}, {transform_indices = @transform_3, window_bounds = array<i64: 128, 8>}]} {
    %c0 = arith.constant 0 : index
    %c0_0 = arith.constant 0 : index
    %0 = vector.load %arg2[%c0, %c0_0] : memref<128x48xbf16, #tpu.memory_space<vmem>>, vector<128x48xbf16>
    %c0_1 = arith.constant 0 : index
    %c0_2 = arith.constant 0 : index
    %1 = vector.load %arg3[%c0_1, %c0_2] : memref<48x8xbf16, #tpu.memory_space<vmem>>, vector<48x8xbf16>
    %cst = arith.constant dense<0.000000e+00> : vector<128x8xf32>
    %2 = tpu.matmul %0, %1, %cst {dimension_numbers = #tpu.dot_dimension_numbers<[1], [0], [0], [1], [0, 0, 1, 1], [], []>} : vector<128x48xbf16>, vector<48x8xbf16>, vector<128x8xf32> -> vector<128x8xf32>
    %c0_3 = arith.constant 0 : index
    %c0_4 = arith.constant 0 : index
    %3 = vector.load %arg4[%c0_3, %c0_4] : memref<1x8xf32, #tpu.memory_space<vmem>>, vector<1x8xf32>
    %4 = vector.broadcast %3 : vector<1x8xf32> to vector<128x8xf32>
    %5 = arith.addf %2, %4 : vector<128x8xf32>
    %cst_5 = arith.constant 0.000000e+00 : f32
    %6 = vector.broadcast %cst_5 : f32 to vector<128x8xf32>
    %7 = arith.maximumf %5, %6 : vector<128x8xf32>
    %c0_6 = arith.constant 0 : index
    %c0_7 = arith.constant 0 : index
    %8 = vector.load %arg5[%c0_6, %c0_7] : memref<128x8xf32, #tpu.memory_space<vmem>>, vector<128x8xf32>
    tpu.vector_store %arg5[%c0_6, %c0_7], %7 {strides = array<i32>} : memref<128x8xf32, #tpu.memory_space<vmem>>, vector<128x8xf32>,
    return
  }
  func.func @transform_0(%arg0: i32, %arg1: i32) -> (i32, i32) {
    %c0_i32 = arith.constant 0 : i32
    %c0_i32_0 = arith.constant 0 : i32
    return %arg0, %c0_i32 : i32, i32
  }
  func.func @transform_1(%arg0: i32, %arg1: i32) -> (i32, i32) {
    %c0_i32 = arith.constant 0 : i32
    %c0_i32_0 = arith.constant 0 : i32
    return %c0_i32, %arg1 : i32, i32
  }
  func.func @transform_2(%arg0: i32, %arg1: i32) -> (i32, i32) {
    %c0_i32 = arith.constant 0 : i32
    %c0_i32_0 = arith.constant 0 : i32
    return %c0_i32, %arg1 : i32, i32
  }
  func.func @transform_3(%arg0: i32, %arg1: i32) -> (i32, i32) {
    %c0_i32 = arith.constant 0 : i32
    return %arg0, %arg1 : i32, i32
  }
}

</mosaic_0001>

<bundles_post_ra>
// kernel: tpu_custom_call.1
= control target key start
LH: loop header
LB: loop body
LE: loop exit
PB: predicated region body
PF: predicated region fallthrough
CT: control target
= control target key end

     0   :  { %vm102_vm0 = vcmask 392192   ;;  %vm240_vm1 = vcmask 64512   ;;  %s459_s1 = inlined_call_operand.vmem [shape: bf16[48,8], index: 1, kind: input, shape index: {}]   ;;  %s460_s0 = inlined_call_operand.vmem [shape: bf16[128,48], index: 0, kind: input, shape index: {}]   ;;  %s461_s2 = inlined_call_operand.vmem [shape: f32[1,8], index: 2, kind: input, shape index: {}]   ;;  %s462_s3 = inlined_call_operand.vmem [shape: f32[128,8], index: 3, kind: output, shape index: {}]  }
   0x1   :  { %v320_v0 = vld [vmem:[%s459_s1] sm:$0xff]   ;;  %v321_v1 = vld [vmem:[%s459_s1 + $0x8] sm:$0xff]   ;;  %v322_v2 = vld [vmem:[%s459_s1 + $0x10] sm:$0xff]  }
   0x2   :  { %292 = vmatprep.subr.bf16.mxu0 %v320_v0  ;;  %314 = vmatprep.subr.bf16.mxu1 %v320_v0  ;;  %v323_v3 = vld [vmem:[%s460_s0] sm:$0xff]   ;;  %v325_v5 = vld [vmem:[%s460_s0 + $0x8] sm:$0xff]   ;;  %v327_v7 = vld [vmem:[%s460_s0 + $0x10] sm:$0xff]  }
   0x3   :  { %293 = vmatpush3.bf16.msra.mxu0 %v320_v0  ;;  %317 = vmatpush3.bf16.msra.mxu1 %v320_v0  ;;  %v324_v4 = vld [vmem:[%s460_s0 + $0x20] sm:$0xff]   ;;  %v326_v6 = vld [vmem:[%s460_s0 + $0x28] sm:$0xff]   ;;  %v328_v8 = vld [vmem:[%s460_s0 + $0x30] sm:$0xff]  }
   0x4   :  { %294 = vmatprep.subr.bf16.mxu0 %v321_v1  ;;  %315 = vmatprep.subr.bf16.mxu1 %v321_v1  ;;  %v329_v9 = vld [vmem:[%s460_s0 + $0x18] sm:$0xff]   ;;  %v261_v11 = vld [vmem:[%s461_s2] ss:$0 sm:$0xff] }
   0x5   :  { %298 = vmatprep.mubr.msk.bf16.mxu0 %vm102_vm0, %v323_v3  ;;  %306 = vmatprep.mubr.msk.bf16.mxu1 %vm102_vm0, %v324_v4  ;;  %v330_v10 = vld [vmem:[%s460_s0 + $0x38] sm:$0xff]  }
   0x7   :  { %295 = vmatpush3.bf16.msra.mxu0 %v321_v1  ;;  %318 = vmatpush3.bf16.msra.mxu1 %v321_v1 }
   0x8   :  { %296 = vmatprep.subr.bf16.mxu0 %v322_v2  ;;  %316 = vmatprep.subr.bf16.mxu1 %v322_v2 }
   0xb   :  { %297 = vmatpush3.bf16.msra.mxu0 %v322_v2  ;;  %319 = vmatpush3.bf16.msra.mxu1 %v322_v2 }
   0xe   :  { %299 = vmatmul.mubr.msk.bf16.vlgmr.msra.gmra.mrb[0].mxu0 %vm102_vm0, %v325_v5  ;;  %307 = vmatmul.mubr.msk.bf16.vlgmr.msra.gmra.mrb[0].mxu1 %vm102_vm0, %v326_v6 }
   0xf   :  { %302 = vmatprep.mubr.msk.bf16.mxu0 %vm102_vm0, %v327_v7  ;;  %310 = vmatprep.mubr.msk.bf16.mxu1 %vm102_vm0, %v328_v8 }
  0x16   :  { %303 = vmatmul.mubr.msk.bf16.gmra.mrb[4].mxu0 %vm102_vm0, %v329_v9  ;;  %311 = vmatmul.mubr.msk.bf16.gmra.mrb[4].mxu1 %vm102_vm0, %v330_v10 }
  0xe1   :  { %v300_v12 = vpop.f32.mrb[0].mxu0  ;;  %v308_v13 = vpop.f32.mrb[0].mxu1 }
  0xe2   :  { %v170_v14 = vadd.f32 %v300_v12, %v261_v11  ;;  %v202_v15 = vadd.f32 %v308_v13, %v261_v11  ;;  %v161_v16 = vpop.f32.mrb[1].mxu0  ;;  %v193_v17 = vpop.f32.mrb[1].mxu1 }
  0xe3   :  { %v162_v18 = vadd.f32 %v261_v11, %v161_v16  ;;  %v194_v19 = vadd.f32 %v261_v11, %v193_v17  ;;  %v301_v20 = vpop.f32.mrb[2].mxu0  ;;  %v309_v21 = vpop.f32.mrb[2].mxu1 }
  0xe4   :  { %v226_v22 = vmax.f32 %v170_v14, 0.0  ;;  %v234_v23 = vmax.f32 %v202_v15, 0.0  ;;  %v173_v24 = vadd.f32 %v301_v20, %v261_v11  ;;  %v205_v25 = vadd.f32 %v309_v21, %v261_v11  ;;  %v164_v26 = vpop.f32.mrb[3].mxu0  ;;  %v196_v27 = vpop.f32.mrb[3].mxu1 }
  0xe5   :  { %v224_v28 = vmax.f32 %v162_v18, 0.0  ;;  %v232_v29 = vmax.f32 %v194_v19, 0.0  ;;  %v165_v30 = vadd.f32 %v261_v11, %v164_v26  ;;  %v197_v31 = vadd.f32 %v261_v11, %v196_v27 }
  0xe6   :  { %243 = vst.msk [vmem:[%s462_s3 + $0x10] sm:$0xff] %vm240_vm1, %v226_v22  ;;  %251 = vst.msk [vmem:[%s462_s3 + $0x50] sm:$0xff] %vm240_vm1, %v234_v23  ;;  %v227_v32 = vmax.f32 %v173_v24, 0.0  ;;  %v235_v33 = vmax.f32 %v205_v25, 0.0 }
  0xe7   :  { %241 = vst.msk [vmem:[%s462_s3] sm:$0xff] %vm240_vm1, %v224_v28  ;;  %249 = vst.msk [vmem:[%s462_s3 + $0x40] sm:$0xff] %vm240_vm1, %v232_v29  ;;  %v225_v34 = vmax.f32 %v165_v30, 0.0  ;;  %v233_v35 = vmax.f32 %v197_v31, 0.0 }
  0xe8   :  { %244 = vst.msk [vmem:[%s462_s3 + $0x18] sm:$0xff] %vm240_vm1, %v227_v32  ;;  %252 = vst.msk [vmem:[%s462_s3 + $0x58] sm:$0xff] %vm240_vm1, %v235_v33 }
  0xe9   :  { %242 = vst.msk [vmem:[%s462_s3 + $0x8] sm:$0xff] %vm240_vm1, %v225_v34  ;;  %250 = vst.msk [vmem:[%s462_s3 + $0x48] sm:$0xff] %vm240_vm1, %v233_v35  ;;  %v304_v36 = vpop.f32.mrb[4].mxu0  ;;  %v312_v37 = vpop.f32.mrb[4].mxu1 }
  0xea   :  { %v186_v38 = vadd.f32 %v304_v36, %v261_v11  ;;  %v218_v39 = vadd.f32 %v312_v37, %v261_v11  ;;  %v177_v40 = vpop.f32.mrb[5].mxu0  ;;  %v209_v41 = vpop.f32.mrb[5].mxu1 }
  0xeb   :  { %v178_v42 = vadd.f32 %v261_v11, %v177_v40  ;;  %v210_v43 = vadd.f32 %v261_v11, %v209_v41  ;;  %v305_v44 = vpop.f32.mrb[6].mxu0  ;;  %v313_v45 = vpop.f32.mrb[6].mxu1 }
  0xec   :  { %v230_v46 = vmax.f32 %v186_v38, 0.0  ;;  %v238_v47 = vmax.f32 %v218_v39, 0.0  ;;  %v189_v48 = vadd.f32 %v305_v44, %v261_v11  ;;  %v221_v49 = vadd.f32 %v313_v45, %v261_v11  ;;  %v180_v50 = vpop.f32.mrb[7].mxu0  ;;  %v212_v51 = vpop.f32.mrb[7].mxu1 }
  0xed   :  { %v228_v52 = vmax.f32 %v178_v42, 0.0  ;;  %v236_v53 = vmax.f32 %v210_v43, 0.0  ;;  %v181_v54 = vadd.f32 %v261_v11, %v180_v50  ;;  %v213_v55 = vadd.f32 %v261_v11, %v212_v51 }
  0xee   :  { %247 = vst.msk [vmem:[%s462_s3 + $0x30] sm:$0xff] %vm240_vm1, %v230_v46  ;;  %255 = vst.msk [vmem:[%s462_s3 + $0x70] sm:$0xff] %vm240_vm1, %v238_v47  ;;  %v231_v56 = vmax.f32 %v189_v48, 0.0  ;;  %v239_v57 = vmax.f32 %v221_v49, 0.0 }
  0xef   :  { %245 = vst.msk [vmem:[%s462_s3 + $0x20] sm:$0xff] %vm240_vm1, %v228_v52  ;;  %253 = vst.msk [vmem:[%s462_s3 + $0x60] sm:$0xff] %vm240_vm1, %v236_v53  ;;  %v229_v58 = vmax.f32 %v181_v54, 0.0  ;;  %v237_v59 = vmax.f32 %v213_v55, 0.0 }
  0xf0   :  { %248 = vst.msk [vmem:[%s462_s3 + $0x38] sm:$0xff] %vm240_vm1, %v231_v56  ;;  %256 = vst.msk [vmem:[%s462_s3 + $0x78] sm:$0xff] %vm240_vm1, %v239_v57 }
  0xf1   :  { %246 = vst.msk [vmem:[%s462_s3 + $0x28] sm:$0xff] %vm240_vm1, %v229_v58  ;;  %254 = vst.msk [vmem:[%s462_s3 + $0x68] sm:$0xff] %vm240_vm1, %v237_v59 }

</bundles_post_ra>
